<compile_context>
chip_gen: v5e
topology: v5e:2x2
jax: 0.10.0
libtpu: 0.0.40
codegen_flags: <defaults>
</compile_context>

<pallas_src>
import functools
import math

import jax
import jax.numpy as jnp
from jax.experimental import pallas as pl
from jax.experimental.pallas import tpu as pltpu

# ---- problem sizes (small, consistent with typical use of the module) -------
B = 2            # batch
H = 4            # heads
S = 8            # sequence length
D = 16           # per-head feature dim
TEMPERATURE = float(D) ** 0.5


def sdpa_kernel(q_ref, k_ref, v_ref, av_ref, attn_ref, *, inv_temperature):
    # q_ref/k_ref: (G, S, D)   v_ref: (G, S, Dv)   G = flattened (batch*heads)
    # Scale once (f32), then feed bf16 operands to the MXU with f32 accumulation.
    q = (q_ref[...] * jnp.float32(inv_temperature)).astype(jnp.bfloat16)
    k = k_ref[...].astype(jnp.bfloat16)
    v = v_ref[...].astype(jnp.bfloat16)

    # Batched contraction over all (batch, head) slices in one MXU sequence.
    scores = jnp.einsum('gqd,gkd->gqk', q, k,
                        preferred_element_type=jnp.float32)        # (G, S, S) f32

    # Numerically stable softmax in f32; reciprocal goes to the EUP slot.
    m = jnp.max(scores, axis=-1, keepdims=True)
    e = jnp.exp(scores - m)
    denom = jnp.sum(e, axis=-1, keepdims=True)
    attn = e * pl.reciprocal(denom, approx=True)                   # (G, S, S) f32
    # TODO(synk): dropout on attn is a no-op in eval mode; not implemented.

    av = jnp.einsum('gqk,gkd->gqd', attn.astype(jnp.bfloat16), v,
                    preferred_element_type=jnp.float32)            # (G, S, Dv) f32

    av_ref[...] = av.astype(av_ref.dtype)
    attn_ref[...] = attn.astype(attn_ref.dtype)


def scaled_dot_product_attention(q, k, v, temperature):
    """q, k: (..., S, D); v: (..., S, Dv). Returns (attn_value, attn_logits)."""
    lead = q.shape[:-2]
    Sq, Dk = q.shape[-2], q.shape[-1]
    Sk = k.shape[-2]
    Dv = v.shape[-1]
    G = int(math.prod(lead)) if lead else 1

    qf = q.reshape(G, Sq, Dk)
    kf = k.reshape(G, Sk, Dk)
    vf = v.reshape(G, Sk, Dv)

    kernel = functools.partial(sdpa_kernel, inv_temperature=1.0 / float(temperature))

    av, attn = pl.pallas_call(
        kernel,
        out_shape=(jax.ShapeDtypeStruct((G, Sq, Dv), jnp.float32),
                   jax.ShapeDtypeStruct((G, Sq, Sk), jnp.float32)),
        grid=(1,),  # single step: whole problem in one kernel invocation
        in_specs=[
            pl.BlockSpec((G, Sq, Dk), lambda i: (0, 0, 0)),
            pl.BlockSpec((G, Sk, Dk), lambda i: (0, 0, 0)),
            pl.BlockSpec((G, Sk, Dv), lambda i: (0, 0, 0)),
        ],
        out_specs=(
            pl.BlockSpec((G, Sq, Dv), lambda i: (0, 0, 0)),
            pl.BlockSpec((G, Sq, Sk), lambda i: (0, 0, 0)),
        ),
        compiler_params=pltpu.CompilerParams(
            dimension_semantics=("arbitrary",)),
    )(qf, kf, vf)

    attn_value = av.reshape(*lead, Sq, Dv)
    attn_logits = attn.reshape(*lead, Sq, Sk)
    return attn_value, attn_logits


def reference(q, k, v, temperature):
    # pure-JAX reference of the PyTorch forward (eval mode, mask=None)
    scores = jnp.einsum('...qd,...kd->...qk', q / temperature, k)
    attn = jax.nn.softmax(scores, axis=-1)
    attn_value = jnp.einsum('...qk,...kd->...qd', attn, v)
    return attn_value, attn


if __name__ == "__main__":
    key = jax.random.PRNGKey(0)
    kq, kk, kv = jax.random.split(key, 3)

    q = jax.random.normal(kq, (B, H, S, D), jnp.float32)
    k = jax.random.normal(kk, (B, H, S, D), jnp.float32)
    v = jax.random.normal(kv, (B, H, S, D), jnp.float32)

    attn_value, attn_logits = scaled_dot_product_attention(q, k, v, TEMPERATURE)
    attn_value = jax.block_until_ready(attn_value)
    attn_logits = jax.block_until_ready(attn_logits)

    ref_value, ref_logits = reference(q, k, v, TEMPERATURE)

    assert attn_value.shape == (B, H, S, D)
    assert attn_logits.shape == (B, H, S, S)
    assert jnp.allclose(attn_value, ref_value, rtol=2e-2, atol=2e-2), \
        "attn_value mismatch vs reference"
    assert jnp.allclose(attn_logits, ref_logits, rtol=2e-2, atol=2e-2), \
        "attn_logits mismatch vs reference"

    print("KERNEL_OK")
</pallas_src>

<mosaic_0001>
module attributes {stable_mosaic.version = 11 : i64} {
  func.func @sdpa_kernel(%arg0: i32, %arg1: memref<8x8x16xf32, #tpu.memory_space<vmem>>, %arg2: memref<8x8x16xf32, #tpu.memory_space<vmem>>, %arg3: memref<8x8x16xf32, #tpu.memory_space<vmem>>, %arg4: memref<8x8x16xf32, #tpu.memory_space<vmem>>, %arg5: memref<8x8x8xf32, #tpu.memory_space<vmem>>) attributes {dimension_semantics = [#tpu.dimension_semantics<arbitrary>], iteration_bounds = array<i64: 1>, scalar_prefetch = 0 : i64, scratch_operands = 0 : i64, tpu.core_type = #tpu.core_type<tc>, window_params = [{pipeline_mode = #tpu.pipeline_mode<synchronous>, transform_indices = @transform_0, window_bounds = array<i64: 8, 8, 16>}, {pipeline_mode = #tpu.pipeline_mode<synchronous>, transform_indices = @transform_1, window_bounds = array<i64: 8, 8, 16>}, {pipeline_mode = #tpu.pipeline_mode<synchronous>, transform_indices = @transform_2, window_bounds = array<i64: 8, 8, 16>}, {pipeline_mode = #tpu.pipeline_mode<synchronous>, transform_indices = @transform_3, window_bounds = array<i64: 8, 8, 16>}, {pipeline_mode = #tpu.pipeline_mode<synchronous>, transform_indices = @transform_4, window_bounds = array<i64: 8, 8, 8>}]} {
    %c0 = arith.constant 0 : index
    %c0_0 = arith.constant 0 : index
    %c0_1 = arith.constant 0 : index
    %0 = vector.load %arg1[%c0, %c0_0, %c0_1] : memref<8x8x16xf32, #tpu.memory_space<vmem>>, vector<8x8x16xf32>
    %cst = arith.constant 2.500000e-01 : f32
    %1 = vector.broadcast %cst : f32 to vector<8x8x16xf32>
    %2 = arith.mulf %0, %1 : vector<8x8x16xf32>
    %3 = arith.truncf %2 : vector<8x8x16xf32> to vector<8x8x16xbf16>
    %c0_2 = arith.constant 0 : index
    %c0_3 = arith.constant 0 : index
    %c0_4 = arith.constant 0 : index
    %4 = vector.load %arg2[%c0_2, %c0_3, %c0_4] : memref<8x8x16xf32, #tpu.memory_space<vmem>>, vector<8x8x16xf32>
    %5 = arith.truncf %4 : vector<8x8x16xf32> to vector<8x8x16xbf16>
    %c0_5 = arith.constant 0 : index
    %c0_6 = arith.constant 0 : index
    %c0_7 = arith.constant 0 : index
    %6 = vector.load %arg3[%c0_5, %c0_6, %c0_7] : memref<8x8x16xf32, #tpu.memory_space<vmem>>, vector<8x8x16xf32>
    %7 = arith.truncf %6 : vector<8x8x16xf32> to vector<8x8x16xbf16>
    "tpu.trace_start"() <{level = 10 : i32, message = "gqd,gkd->gqk"}> : () -> ()
    %cst_8 = arith.constant dense<0.000000e+00> : vector<8x8x8xf32>
    %8 = tpu.matmul %3, %5, %cst_8 {dimension_numbers = #tpu.dot_dimension_numbers<[2], [2], [1], [1], [0, 0, 0, 1, 1, 1], [0], [0]>} : vector<8x8x16xbf16>, vector<8x8x16xbf16>, vector<8x8x8xf32> -> vector<8x8x8xf32>
    "tpu.trace_stop"() : () -> ()
    %cst_9 = arith.constant dense<0xFF800000> : vector<8x8xf32>
    %9 = vector.multi_reduction <maximumf>, %8, %cst_9 [2] : vector<8x8x8xf32> to vector<8x8xf32>
    %10 = vector.shape_cast %9 : vector<8x8xf32> to vector<8x8x1xf32>
    %11 = vector.broadcast %10 : vector<8x8x1xf32> to vector<8x8x8xf32>
    %12 = arith.subf %8, %11 : vector<8x8x8xf32>
    %13 = math.exp %12 : vector<8x8x8xf32>
    %cst_10 = arith.constant dense<0.000000e+00> : vector<8x8xf32>
    %14 = vector.multi_reduction <add>, %13, %cst_10 [2] : vector<8x8x8xf32> to vector<8x8xf32>
    %15 = vector.shape_cast %14 : vector<8x8xf32> to vector<8x8x1xf32>
    %16 = tpu.reciprocal %15 {approx = true} : vector<8x8x1xf32> -> vector<8x8x1xf32>
    %17 = vector.broadcast %16 : vector<8x8x1xf32> to vector<8x8x8xf32>
    %18 = arith.mulf %13, %17 : vector<8x8x8xf32>
    %19 = arith.truncf %18 : vector<8x8x8xf32> to vector<8x8x8xbf16>
    "tpu.trace_start"() <{level = 10 : i32, message = "gqk,gkd->gqd"}> : () -> ()
    %cst_11 = arith.constant dense<0.000000e+00> : vector<8x8x16xf32>
    %20 = tpu.matmul %19, %7, %cst_11 {dimension_numbers = #tpu.dot_dimension_numbers<[2], [1], [1], [2], [0, 0, 0, 1, 1, 2], [0], [0]>} : vector<8x8x8xbf16>, vector<8x8x16xbf16>, vector<8x8x16xf32> -> vector<8x8x16xf32>
    "tpu.trace_stop"() : () -> ()
    %c0_12 = arith.constant 0 : index
    %c0_13 = arith.constant 0 : index
    %c0_14 = arith.constant 0 : index
    %21 = vector.load %arg4[%c0_12, %c0_13, %c0_14] : memref<8x8x16xf32, #tpu.memory_space<vmem>>, vector<8x8x16xf32>
    tpu.vector_store %arg4[%c0_12, %c0_13, %c0_14], %20 {strides = array<i32>} : memref<8x8x16xf32, #tpu.memory_space<vmem>>, vector<8x8x16xf32>,
    %c0_15 = arith.constant 0 : index
    %c0_16 = arith.constant 0 : index
    %c0_17 = arith.constant 0 : index
    %22 = vector.load %arg5[%c0_15, %c0_16, %c0_17] : memref<8x8x8xf32, #tpu.memory_space<vmem>>, vector<8x8x8xf32>
    tpu.vector_store %arg5[%c0_15, %c0_16, %c0_17], %18 {strides = array<i32>} : memref<8x8x8xf32, #tpu.memory_space<vmem>>, vector<8x8x8xf32>,
    return
  }
  func.func @transform_0(%arg0: i32) -> (i32, i32, i32) {
    %c0_i32 = arith.constant 0 : i32
    %c0_i32_0 = arith.constant 0 : i32
    %c0_i32_1 = arith.constant 0 : i32
    %c0_i32_2 = arith.constant 0 : i32
    return %c0_i32, %c0_i32_0, %c0_i32_1 : i32, i32, i32
  }
  func.func @transform_1(%arg0: i32) -> (i32, i32, i32) {
    %c0_i32 = arith.constant 0 : i32
    %c0_i32_0 = arith.constant 0 : i32
    %c0_i32_1 = arith.constant 0 : i32
    %c0_i32_2 = arith.constant 0 : i32
    return %c0_i32, %c0_i32_0, %c0_i32_1 : i32, i32, i32
  }
  func.func @transform_2(%arg0: i32) -> (i32, i32, i32) {
    %c0_i32 = arith.constant 0 : i32
    %c0_i32_0 = arith.constant 0 : i32
    %c0_i32_1 = arith.constant 0 : i32
    %c0_i32_2 = arith.constant 0 : i32
    return %c0_i32, %c0_i32_0, %c0_i32_1 : i32, i32, i32
  }
  func.func @transform_3(%arg0: i32) -> (i32, i32, i32) {
    %c0_i32 = arith.constant 0 : i32
    %c0_i32_0 = arith.constant 0 : i32
    %c0_i32_1 = arith.constant 0 : i32
    %c0_i32_2 = arith.constant 0 : i32
    return %c0_i32, %c0_i32_0, %c0_i32_1 : i32, i32, i32
  }
  func.func @transform_4(%arg0: i32) -> (i32, i32, i32) {
    %c0_i32 = arith.constant 0 : i32
    %c0_i32_0 = arith.constant 0 : i32
    %c0_i32_1 = arith.constant 0 : i32
    %c0_i32_2 = arith.constant 0 : i32
    return %c0_i32, %c0_i32_0, %c0_i32_1 : i32, i32, i32
  }
}

</mosaic_0001>

<bundles_post_ra>
// kernel: tpu_custom_call.1
= control target key start
LH: loop header
LB: loop body
LE: loop exit
PB: predicated region body
PF: predicated region fallthrough
CT: control target
= control target key end

     0   :  { %10 = vsyncpa [#allocation3], 0  ;;  %s920_s0 = inlined_call_operand.hbm [shape: f32[8,8,16], index: 0, kind: input, shape index: {}]   ;;  %s921_s1 = inlined_call_operand.hbm [shape: f32[8,8,16], index: 1, kind: input, shape index: {}]   ;;  %s922_s2 = inlined_call_operand.hbm [shape: f32[8,8,16], index: 2, kind: input, shape index: {}]   ;;  %s923_s3 = inlined_call_operand.hbm [shape: f32[8,8,16], index: 3, kind: output, shape index: {0}]   ;;  %s924_s4 = inlined_call_operand.hbm [shape: f32[8,8,8], index: 4, kind: output, shape index: {1}]  }
   0x1   :  { %11 = vsyncpa [#allocation6], 0 }
   0x2   :  { %12 = vsyncpa [#allocation4], 0 }
   0x3   :  { %13 = vsyncpa [#allocation10], 0  ;;  %s31_s17 = sshll.u32 %s921_s1, 4  ;;  %s762_s18 = smov [#allocation5]   ;;  %s32_s17 = int_to_ptr.hbm [resolvable:$true] %s31_s17 }
   0x4   :  { %s33_s19 = sshll.u32 %s762_s18, 4  ;;  %s18_s22 = sshll.u32 %s920_s0, 4  ;;  %s34_s19 = int_to_ptr.vmem [resolvable:$true] %s33_s19  ;;  %s19_s22 = int_to_ptr.hbm [resolvable:$true] %s18_s22 }
   0x5   :  { %s763_s23 = smov 128   ;;  %s764_s24 = smov 8  }
   0x6   :  { %39 = dma.hbm_to_vmem [thread:$0]  %s32_s17, 1024, %s34_s19, [#allocation6], %s763_s23, %s763_s23, %s764_s24  }
   0x7   :  { %s765_s25 = smov [#allocation2]   ;;  %s44_s1 = sshll.u32 %s922_s2, 4  ;;  %s45_s1 = int_to_ptr.hbm [resolvable:$true] %s44_s1 }
   0x8   :  { %s20_s26 = sshll.u32 %s765_s25, 4  ;;  %s766_s0 = smov [#allocation7]   ;;  %s21_s26 = int_to_ptr.vmem [resolvable:$true] %s20_s26 }
   0x9   :  { %26 = dma.hbm_to_vmem [thread:$0]  %s19_s22, 1024, %s21_s26, [#allocation3], %s763_s23, %s763_s23, %s764_s24  }
   0xa   :  { %s46_s29 = sshll.u32 %s766_s0, 4  ;;  %s47_s29 = int_to_ptr.vmem [resolvable:$true] %s46_s29 }
   0xb   :  { %52 = dma.hbm_to_vmem [thread:$0]  %s45_s1, 1024, %s47_s29, [#allocation6], %s763_s23, %s763_s23, %s764_s24  }
   0xc   :  { %754 = dma.done.wait [#allocation3], 1024  }
   0xd   :  { %755 = vsyncadd [#allocation3], 4294966272 }
   0xe   :  { %756 = dma.done.wait [#allocation6], 2048  }
   0xf   :  { %757 = vsyncadd [#allocation6], 4294965248  ;;  %v90_v0 = vld [vmem:[#allocation5] sm:$0xff]  ;;  %vm122_vm0 = vcmask 130048   ;;  %v91_v1 = vld [vmem:[#allocation5 + $0x8] sm:$0xff]  ;;  %vm275_vm1 = vcmask 64512  }
  0x10   :  { %v92_v2 = vld [vmem:[#allocation5 + $0x10] sm:$0xff]  ;;  %v98_v3 = vpack.c.bf16 %v90_v0, %v90_v0  ;;  %v99_v4 = vpack.c.bf16 %v91_v1, %v91_v1  ;;  %v93_v6 = vld [vmem:[#allocation5 + $0x18] sm:$0xff]  ;;  %v66_v7 = vld [vmem:[#allocation2] sm:$0xff]  ;;  %vm375_vm2 = vcmask 1043456   ;;  %s767_s2 = smov [#allocation9]   ;;  %s560_s7 = sshll.u32 %s924_s4, 4  ;;  %s561_s7 = int_to_ptr.hbm [resolvable:$true] %s560_s7 }
  0x11   :  { %v100_v5 = vpack.c.bf16 %v92_v2, %v92_v2  ;;  %v67_v8 = vld [vmem:[#allocation2 + $0x8] sm:$0xff]  ;;  %v101_v9 = vpack.c.bf16 %v93_v6, %v93_v6  ;;  %v74_v10 = vmul.f32 0.25, %v66_v7  ;;  %v68_v11 = vld [vmem:[#allocation2 + $0x10] sm:$0xff]  ;;  %v69_v12 = vld [vmem:[#allocation2 + $0x18] sm:$0xff]  ;;  %s558_s30 = sshll.u32 %s767_s2, 4  ;;  %s768_s4 = smov [#allocation8]   ;;  %s559_s30 = int_to_ptr.vmem [resolvable:$true] %s558_s30 }
  0x12   :  { %v96_v13 = vld [vmem:[#allocation5 + $0x30] sm:$0xff]  ;;  %v127_v14 = vsel %vm122_vm0, %v98_v3, 0  ;;  %v146_v15 = vsel %vm122_vm0, %v99_v4, 0  ;;  %v75_v17 = vmul.f32 0.25, %v67_v8  ;;  %v97_v18 = vld [vmem:[#allocation5 + $0x38] sm:$0xff]  ;;  %v95_v19 = vld [vmem:[#allocation5 + $0x28] sm:$0xff] }
  0x13   :  { %v165_v16 = vsel %vm122_vm0, %v100_v5, 0  ;;  %136 = vmatpush.bf16.xpose.msra.mxu0 %v127_v14  ;;  %155 = vmatpush.bf16.xpose.msra.mxu1 %v146_v15  ;;  %v184_v20 = vsel %vm122_vm0, %v101_v9, 0  ;;  %v76_v21 = vmul.f32 0.25, %v68_v11  ;;  %v77_v22 = vmul.f32 0.25, %v69_v12  ;;  %v94_v23 = vld [vmem:[#allocation5 + $0x20] sm:$0xff]  ;;  %v71_v36 = vld [vmem:[#allocation2 + $0x28] sm:$0xff] }
  0x14   :  { %174 = vmatpush.bf16.xpose.msra.mxu2 %v165_v16  ;;  %193 = vmatpush.bf16.xpose.msra.mxu3 %v184_v20  ;;  %v104_v24 = vpack.c.bf16 %v96_v13, %v96_v13  ;;  %v105_v25 = vpack.c.bf16 %v97_v18, %v97_v18  ;;  %v103_v26 = vpack.c.bf16 %v95_v19, %v95_v19  ;;  %v70_v37 = vld [vmem:[#allocation2 + $0x20] sm:$0xff]  ;;  %v72_v38 = vld [vmem:[#allocation2 + $0x30] sm:$0xff]  ;;  %v73_v39 = vld [vmem:[#allocation2 + $0x38] sm:$0xff]  ;;  %v79_v40 = vmul.f32 0.25, %v71_v36  ;;  %s545_s8 = sshll.u32 %s768_s4, 4  ;;  %s547_s11 = sshll.u32 %s923_s3, 4  ;;  %s546_s8 = int_to_ptr.vmem [resolvable:$true] %s545_s8  ;;  %s548_s11 = int_to_ptr.hbm [resolvable:$true] %s547_s11 }
  0x15   :  { %v102_v27 = vpack.c.bf16 %v94_v23, %v94_v23  ;;  %v82_v28 = vpack.c.bf16 %v74_v10, %v74_v10  ;;  %v83_v29 = vpack.c.bf16 %v75_v17, %v75_v17  ;;  %v84_v32 = vpack.c.bf16 %v76_v21, %v76_v21 }
  0x16   :  { %v241_v30 = vsel %vm122_vm0, %v104_v24, 0  ;;  %v260_v31 = vsel %vm122_vm0, %v105_v25, 0  ;;  %v85_v33 = vpack.c.bf16 %v77_v22, %v77_v22  ;;  %v222_v34 = vsel %vm122_vm0, %v103_v26, 0 }
  0x17   :  { %v203_v35 = vsel %vm122_vm0, %v102_v27, 0  ;;  %v78_v41 = vmul.f32 0.25, %v70_v37  ;;  %v80_v42 = vmul.f32 0.25, %v72_v38  ;;  %v81_v43 = vmul.f32 0.25, %v73_v39 }
  0x18   :  { %v87_v44 = vpack.c.bf16 %v79_v40, %v79_v40 }
  0x19   :  { %v86_v45 = vpack.c.bf16 %v78_v41, %v78_v41  ;;  %v88_v46 = vpack.c.bf16 %v80_v42, %v80_v42  ;;  %v89_v47 = vpack.c.bf16 %v81_v43, %v81_v43 }
  0x1a   :  { %579 = vmatmul.msk.bf16.vlgmr.msra.gmra.mxu0 %vm122_vm0, %v82_v28  ;;  %580 = vmatmul.msk.bf16.vlgmr.msra.gmra.mxu1 %vm122_vm0, %v83_v29 }
  0x1b   :  { %231 = vmatpush.bf16.xpose.msrb.mxu1 %v222_v34  ;;  %212 = vmatpush.bf16.xpose.msrb.mxu0 %v203_v35 }
  0x1c   :  { %250 = vmatpush.bf16.xpose.msrb.mxu2 %v241_v30  ;;  %269 = vmatpush.bf16.xpose.msrb.mxu3 %v260_v31 }
  0x1d   :  { %581 = vmatmul.msk.bf16.vlgmr.msra.gmra.mxu2 %vm122_vm0, %v84_v32  ;;  %582 = vmatmul.msk.bf16.vlgmr.msra.gmra.mxu3 %vm122_vm0, %v85_v33 }
  0x2a   :  { %584 = vmatmul.msk.bf16.vlgmr.msrb.gmra.mxu1 %vm122_vm0, %v87_v44  ;;  %583 = vmatmul.msk.bf16.vlgmr.msrb.gmra.mxu0 %vm122_vm0, %v86_v45 }
  0x2d   :  { %585 = vmatmul.msk.bf16.vlgmr.msrb.gmra.mxu2 %vm122_vm0, %v88_v46  ;;  %586 = vmatmul.msk.bf16.vlgmr.msrb.gmra.mxu3 %vm122_vm0, %v89_v47 }
  0x97   :  { %v138_v48 = vpop.f32.mrf.mxu0  ;;  %v157_v49 = vpop.f32.mrf.mxu1 }
  0x98   :  { %v276_v50 = vsel %vm275_vm1, %v138_v48, -inf  ;;  %v279_v53 = vsel %vm275_vm1, %v157_v49, -inf }
  0x99   :  { %277 = vmax.xlane.f32.xlu1 %v276_v50 }
  0x9f   :  { %v159_v55 = vpop.f32.mrf.mxu1  ;;  %v140_v56 = vpop.f32.mrf.mxu0 }
  0xa0   :  { %v176_v51 = vpop.f32.mrf.mxu2  ;;  %v195_v52 = vpop.f32.mrf.mxu3 }
  0xa1   :  { %v282_v54 = vsel %vm275_vm1, %v176_v51, -inf  ;;  %280 = vmax.xlane.f32.xlu1 %v279_v53  ;;  %v285_v57 = vsel %vm275_vm1, %v195_v52, -inf }
  0xa2   :  { %283 = vmax.xlane.f32.xlu0 %v282_v54  ;;  %v109_v54 = vld [vmem:[#allocation7 + $0x18] sm:$0xff] }
  0xa3   :  { %v117_v55 = vpack.c.bf16 %v109_v54, %v109_v54 }
  0xa5   :  { %v434_v56 = vsel %vm375_vm2, %v117_v55, 0 }
  0xa6   :  { %443 = vmatpush.bf16.msra.mxu3 %v434_v56 }
  0xa7   :  { %v233_v60 = vpop.f32.mrf.mxu1  ;;  %v214_v61 = vpop.f32.mrf.mxu0 }
  0xa8   :  { %v178_v58 = vpop.f32.mrf.mxu2  ;;  %v197_v59 = vpop.f32.mrf.mxu3  ;;  %v291_v62 = vsel %vm275_vm1, %v233_v60, -inf  ;;  %v288_v63 = vsel %vm275_vm1, %v214_v61, -inf }
  0xa9   :  { %292 = vmax.xlane.f32.xlu1 %v291_v62 }
  0xaa   :  { %286 = vmax.xlane.f32.xlu0 %v285_v57  ;;  %v107_v57 = vld [vmem:[#allocation7 + $0x8] sm:$0xff] }
  0xab   :  { %v115_v58 = vpack.c.bf16 %v107_v57, %v107_v57 }
  0xad   :  { %v396_v59 = vsel %vm375_vm2, %v115_v58, 0 }
  0xae   :  { %405 = vmatpush.bf16.msra.mxu1 %v396_v59 }
  0xaf   :  { %v216_v3 = vpop.f32.mrf.mxu0  ;;  %v235_v4 = vpop.f32.mrf.mxu1 }
  0xb0   :  { %v252_v0 = vpop.f32.mrf.mxu2  ;;  %v271_v1 = vpop.f32.mrf.mxu3  ;;  %v113_v3 = vld [vmem:[#allocation7 + $0x38] sm:$0xff] }
  0xb1   :  { %v294_v2 = vsel %vm275_vm1, %v252_v0, -inf  ;;  %v297_v5 = vsel %vm275_vm1, %v271_v1, -inf  ;;  %v121_v4 = vpack.c.bf16 %v113_v3, %v113_v3 }
  0xb2   :  { %295 = vmax.xlane.f32.xlu2 %v294_v2  ;;  %289 = vmax.xlane.f32.xlu0 %v288_v63 }
  0xb8   :  { %v254_v6 = vpop.f32.mrf.mxu2  ;;  %v273_v7 = vpop.f32.mrf.mxu3 }
  0xb9   :  { %v111_v6 = vld [vmem:[#allocation7 + $0x28] sm:$0xff] }
  0xba   :  { %298 = vmax.xlane.f32.xlu2 %v297_v5  ;;  %v510_v5 = vsel %vm375_vm2, %v121_v4, 0  ;;  %v119_v7 = vpack.c.bf16 %v111_v6, %v111_v6 }
  0xbb   :  { %519 = vmatpush.bf16.msrb.mxu3 %v510_v5 }
 0x10c   :  { %v278_v8 = vpop.xlane.xlu1 %277 }
 0x10d   :  { %v300_v9 = vsub.f32 %v138_v48, %v278_v8  ;;  %v106_v48 = vld [vmem:[#allocation7] sm:$0xff] }
 0x10f   :  { %v308_v10 = vmul.f32 1.442695, %v300_v9 }
 0x111   :  { %602 = vpow2.f32 %v308_v10 }
 0x114   :  { %v281_v13 = vpop.xlane.xlu1 %280 }
 0x115   :  { %v284_v11 = vpop.xlane.xlu0 %283  ;;  %v301_v15 = vsub.f32 %v157_v49, %v281_v13  ;;  %v114_v49 = vpack.c.bf16 %v106_v48, %v106_v48 }
 0x116   :  { %v302_v12 = vsub.f32 %v176_v51, %v284_v11  ;;  %v108_v51 = vld [vmem:[#allocation7 + $0x10] sm:$0xff]  ;;  %v472_v11 = vsel %vm375_vm2, %v119_v7, 0 }
 0x117   :  { %v836_v16 = vpop.eup %602  ;;  %v310_v18 = vmul.f32 1.442695, %v301_v15  ;;  %v377_v50 = vsel %vm375_vm2, %v114_v49, 0  ;;  %481 = vmatpush.bf16.msrb.mxu1 %v472_v11 }
 0x118   :  { %v312_v14 = vmul.f32 1.442695, %v302_v12  ;;  %v324_v17 = vsel %vm275_vm1, %v836_v16, 0.0  ;;  %386 = vmatpush.bf16.msra.mxu0 %v377_v50 }
 0x119   :  { %325 = vadd.xlane.f32.xlu1 %v324_v17 }
 0x11a   :  { %604 = vpow2.f32 %v312_v14 }
 0x11b   :  { %606 = vpow2.f32 %v310_v18 }
 0x11c   :  { %v293_v24 = vpop.xlane.xlu1 %292 }
 0x11d   :  { %v287_v19 = vpop.xlane.xlu0 %286  ;;  %v305_v31 = vsub.f32 %v233_v60, %v293_v24  ;;  %v112_v60 = vld [vmem:[#allocation7 + $0x30] sm:$0xff] }
 0x11e   :  { %v303_v20 = vsub.f32 %v195_v52, %v287_v19  ;;  %v116_v52 = vpack.c.bf16 %v108_v51, %v108_v51  ;;  %v120_v62 = vpack.c.bf16 %v112_v60, %v112_v60 }
 0x11f   :  { %v318_v36 = vmul.f32 1.442695, %v305_v31 }
 0x120   :  { %v840_v21 = vpop.eup %604  ;;  %v314_v22 = vmul.f32 1.442695, %v303_v20  ;;  %v415_v53 = vsel %vm375_vm2, %v116_v52, 0 }
 0x121   :  { %v330_v23 = vsel %vm275_vm1, %v840_v21, 0.0  ;;  %v844_v27 = vpop.eup %606  ;;  %424 = vmatpush.bf16.msra.mxu2 %v415_v53 }
 0x122   :  { %608 = vpow2.f32 %v314_v22  ;;  %331 = vadd.xlane.f32.xlu2 %v330_v23  ;;  %v327_v34 = vsel %vm275_vm1, %v844_v27, 0.0 }
 0x125   :  { %v296_v25 = vpop.xlane.xlu2 %295  ;;  %v290_v26 = vpop.xlane.xlu0 %289 }
 0x126   :  { %v306_v28 = vsub.f32 %v252_v0, %v296_v25  ;;  %v304_v29 = vsub.f32 %v214_v61, %v290_v26  ;;  %v110_v61 = vld [vmem:[#allocation7 + $0x20] sm:$0xff] }
 0x127   :  { %v118_v63 = vpack.c.bf16 %v110_v61, %v110_v61 }
 0x128   :  { %v846_v30 = vpop.eup %608  ;;  %v320_v32 = vmul.f32 1.442695, %v306_v28  ;;  %v316_v33 = vmul.f32 1.442695, %v304_v29 }
 0x129   :  { %v333_v35 = vsel %vm275_vm1, %v846_v30, 0.0  ;;  %v453_v2 = vsel %vm375_vm2, %v118_v63, 0 }
 0x12a   :  { %610 = vpow2.f32 %v320_v32  ;;  %328 = vadd.xlane.f32.xlu2 %v327_v34  ;;  %334 = vadd.xlane.f32.xlu0 %v333_v35 }
 0x12b   :  { %612 = vpow2.f32 %v316_v33  ;;  %462 = vmatpush.bf16.msrb.mxu0 %v453_v2 }
 0x12c   :  { %614 = vpow2.f32 %v318_v36 }
 0x12d   :  { %v299_v37 = vpop.xlane.xlu2 %298 }
 0x12e   :  { %v307_v38 = vsub.f32 %v271_v1, %v299_v37  ;;  %v491_v1 = vsel %vm375_vm2, %v120_v62, 0 }
 0x12f   :  { %500 = vmatpush.bf16.msrb.mxu2 %v491_v1 }
 0x130   :  { %v852_v39 = vpop.eup %610  ;;  %v322_v40 = vmul.f32 1.442695, %v307_v38 }
 0x131   :  { %v854_v41 = vpop.eup %612  ;;  %v342_v42 = vsel %vm275_vm1, %v852_v39, 0.0 }
 0x132   :  { %616 = vpow2.f32 %v322_v40  ;;  %343 = vadd.xlane.f32.xlu0 %v342_v42  ;;  %v336_v43 = vsel %vm275_vm1, %v854_v41, 0.0  ;;  %v860_v44 = vpop.eup %614 }
 0x133   :  { %337 = vadd.xlane.f32.xlu2 %v336_v43  ;;  %v339_v47 = vsel %vm275_vm1, %v860_v44, 0.0 }
 0x138   :  { %v862_v45 = vpop.eup %616 }
 0x139   :  { %v345_v46 = vsel %vm275_vm1, %v862_v45, 0.0 }
 0x13a   :  { %346 = vadd.xlane.f32.xlu1 %v345_v46  ;;  %340 = vadd.xlane.f32.xlu0 %v339_v47 }
 0x18c   :  { %v326_v0 = vpop.xlane.xlu1 %325 }
 0x18d   :  { %618 = vrcp.f32 %v326_v0 }
 0x193   :  { %v619_v8 = vpop.eup %618 }
 0x194   :  { %v356_v10 = vmul.f32 %v619_v8, %v836_v16 }
 0x195   :  { %v332_v9 = vpop.xlane.xlu2 %331 }
 0x196   :  { %620 = vrcp.f32 %v332_v9  ;;  %v364_v12 = vpack.c.bf16 %v356_v10, %v356_v10  ;;  %533 = vst.msk [vmem:[#allocation9] sm:$0xff] %vm275_vm1, %v356_v10 }
 0x198   :  { %587 = vmatmul.msk.bf16.vlgmr.msra.gmra.mxu0 %vm275_vm1, %v364_v12 }
 0x19c   :  { %v621_v13 = vpop.eup %620 }
 0x19d   :  { %v358_v14 = vmul.f32 %v621_v13, %v840_v21  ;;  %v329_v15 = vpop.xlane.xlu2 %328  ;;  %v335_v17 = vpop.xlane.xlu0 %334 }
 0x19e   :  { %622 = vrcp.f32 %v329_v15 }
 0x19f   :  { %v366_v18 = vpack.c.bf16 %v358_v14, %v358_v14  ;;  %535 = vst.msk [vmem:[#allocation9 + $0x10] sm:$0xff] %vm275_vm1, %v358_v14  ;;  %624 = vrcp.f32 %v335_v17 }
 0x1a1   :  { %589 = vmatmul.msk.bf16.vlgmr.msra.gmra.mxu2 %vm275_vm1, %v366_v18 }
 0x1a4   :  { %v623_v16 = vpop.eup %622 }
 0x1a5   :  { %v625_v19 = vpop.eup %624  ;;  %v357_v20 = vmul.f32 %v623_v16, %v844_v27  ;;  %v344_v22 = vpop.xlane.xlu0 %343 }
 0x1a6   :  { %v359_v23 = vmul.f32 %v625_v19, %v846_v30  ;;  %v338_v24 = vpop.xlane.xlu2 %337  ;;  %626 = vrcp.f32 %v344_v22 }
 0x1a7   :  { %v365_v25 = vpack.c.bf16 %v357_v20, %v357_v20  ;;  %534 = vst.msk [vmem:[#allocation9 + $0x8] sm:$0xff] %vm275_vm1, %v357_v20  ;;  %628 = vrcp.f32 %v338_v24 }
 0x1a8   :  { %v367_v21 = vpack.c.bf16 %v359_v23, %v359_v23  ;;  %536 = vst.msk [vmem:[#allocation9 + $0x18] sm:$0xff] %vm275_vm1, %v359_v23 }
 0x1a9   :  { %588 = vmatmul.msk.bf16.vlgmr.msra.gmra.mxu1 %vm275_vm1, %v365_v25 }
 0x1aa   :  { %590 = vmatmul.msk.bf16.vlgmr.msra.gmra.mxu3 %vm275_vm1, %v367_v21 }
 0x1ac   :  { %v627_v26 = vpop.eup %626 }
 0x1ad   :  { %v629_v28 = vpop.eup %628  ;;  %v362_v27 = vmul.f32 %v627_v26, %v852_v39  ;;  %v347_v29 = vpop.xlane.xlu1 %346 }
 0x1ae   :  { %v341_v31 = vpop.xlane.xlu0 %340  ;;  %v360_v30 = vmul.f32 %v629_v28, %v854_v41  ;;  %630 = vrcp.f32 %v347_v29 }
 0x1af   :  { %v370_v32 = vpack.c.bf16 %v362_v27, %v362_v27  ;;  %539 = vst.msk [vmem:[#allocation9 + $0x30] sm:$0xff] %vm275_vm1, %v362_v27  ;;  %632 = vrcp.f32 %v341_v31 }
 0x1b0   :  { %v368_v33 = vpack.c.bf16 %v360_v30, %v360_v30  ;;  %537 = vst.msk [vmem:[#allocation9 + $0x20] sm:$0xff] %vm275_vm1, %v360_v30 }
 0x1b1   :  { %593 = vmatmul.msk.bf16.vlgmr.msrb.gmra.mxu2 %vm275_vm1, %v370_v32 }
 0x1b2   :  { %591 = vmatmul.msk.bf16.vlgmr.msrb.gmra.mxu0 %vm275_vm1, %v368_v33 }
 0x1b4   :  { %v631_v34 = vpop.eup %630 }
 0x1b5   :  { %v633_v35 = vpop.eup %632  ;;  %v363_v36 = vmul.f32 %v631_v34, %v862_v45 }
 0x1b6   :  { %v361_v37 = vmul.f32 %v633_v35, %v860_v44 }
 0x1b7   :  { %v371_v38 = vpack.c.bf16 %v363_v36, %v363_v36  ;;  %540 = vst.msk [vmem:[#allocation9 + $0x38] sm:$0xff] %vm275_vm1, %v363_v36 }
 0x1b8   :  { %v369_v39 = vpack.c.bf16 %v361_v37, %v361_v37  ;;  %538 = vst.msk [vmem:[#allocation9 + $0x28] sm:$0xff] %vm275_vm1, %v361_v37 }
 0x1b9   :  { %566 = dma.vmem_to_hbm [thread:$0]  %s559_s30, 1024, %s561_s7, [#allocation10], %s763_s23, %s763_s23, %s764_s24  }
 0x1ba   :  { %592 = vmatmul.msk.bf16.vlgmr.msrb.gmra.mxu1 %vm275_vm1, %v369_v39  ;;  %594 = vmatmul.msk.bf16.vlgmr.msrb.gmra.mxu3 %vm275_vm1, %v371_v38 }
 0x215   :  { %v388_v40 = vpop.f32.mrf.mxu0 }
 0x216   :  { %525 = vst.msk [vmem:[#allocation8] sm:$0xff] %vm122_vm0, %v388_v40 }
 0x21d   :  { %v390_v41 = vpop.f32.mrf.mxu0 }
 0x224   :  { %v426_v42 = vpop.f32.mrf.mxu2 }
 0x225   :  { %527 = vst.msk [vmem:[#allocation8 + $0x10] sm:$0xff] %vm122_vm0, %v426_v42 }
 0x226   :  { %v407_v43 = vpop.f32.mrf.mxu1 }
 0x227   :  { %526 = vst.msk [vmem:[#allocation8 + $0x8] sm:$0xff] %vm122_vm0, %v407_v43 }
 0x22c   :  { %v428_v44 = vpop.f32.mrf.mxu2 }
 0x22d   :  { %v445_v45 = vpop.f32.mrf.mxu3 }
 0x22e   :  { %528 = vst.msk [vmem:[#allocation8 + $0x18] sm:$0xff] %vm122_vm0, %v445_v45  ;;  %v409_v46 = vpop.f32.mrf.mxu1 }
 0x22f   :  { %v464_v47 = vpop.f32.mrf.mxu0 }
 0x230   :  { %529 = vst.msk [vmem:[#allocation8 + $0x20] sm:$0xff] %vm122_vm0, %v464_v47 }
 0x234   :  { %v502_v48 = vpop.f32.mrf.mxu2 }
 0x235   :  { %v447_v49 = vpop.f32.mrf.mxu3  ;;  %531 = vst.msk [vmem:[#allocation8 + $0x30] sm:$0xff] %vm122_vm0, %v502_v48 }
 0x237   :  { %v466_v50 = vpop.f32.mrf.mxu0  ;;  %v483_v51 = vpop.f32.mrf.mxu1 }
 0x238   :  { %530 = vst.msk [vmem:[#allocation8 + $0x28] sm:$0xff] %vm122_vm0, %v483_v51 }
 0x23c   :  { %v504_v52 = vpop.f32.mrf.mxu2 }
 0x23d   :  { %v521_v53 = vpop.f32.mrf.mxu3 }
 0x23e   :  { %532 = vst.msk [vmem:[#allocation8 + $0x38] sm:$0xff] %vm122_vm0, %v521_v53 }
 0x23f   :  { %v485_v54 = vpop.f32.mrf.mxu1  ;;  %553 = dma.vmem_to_hbm [thread:$0]  %s546_s8, 1024, %s548_s11, [#allocation4], %s763_s23, %s763_s23, %s764_s24  }
 0x245   :  { %v523_v55 = vpop.f32.mrf.mxu3 }
 0x246   :  { %758 = dma.done.wait [#allocation4], 1024  }
 0x247   :  { %759 = vsyncadd [#allocation4], 4294966272 }
 0x248   :  { %760 = dma.done.wait [#allocation10], 1024  }
 0x249   :  { %761 = vsyncadd [#allocation10], 4294966272 }
 0x24a   :  { %575 = vsyncpa [#allocation3], 1 }
 0x24b   :  { %576 = vsyncpa [#allocation6], 1 }
 0x24c   :  { %577 = vsyncpa [#allocation4], 1 }
 0x24d   :  { %578 = vsyncpa [#allocation10], 1 }

</bundles_post_ra>
